<compile_context>
chip_gen: v7x
topology: tpu7x:2x2x1
jax: 0.10.0
libtpu: 0.0.40
codegen_flags: <defaults>
</compile_context>

<pallas_src>
import math
from functools import partial

import jax
import jax.numpy as jnp
from jax.experimental import pallas as pl
from jax.experimental.pallas import tpu as pltpu


def _round_up(v, m):
    return ((v + m - 1) // m) * m


def _cdiv(a, b):
    return -(-a // b)


def _token_kernel(patch_ref, w_ref, pos_ref, out_ref):
    # patch_ref: (1, tT, Kp) bf16   w_ref: (Kp, Cp) bf16   pos_ref: (tT, Cp) f32
    p = patch_ref[0]                                                   # (tT, Kp)
    acc = jnp.dot(p, w_ref[...], preferred_element_type=jnp.float32)   # bf16 MXU, f32 acc
    out_ref[0] = (acc + pos_ref[...]).astype(out_ref.dtype)            # pos(+bias) add in f32, cast once


@partial(jax.jit, static_argnames=("patch_size", "token_tile", "out_dtype"))
def to_token_sequence(x_nchw, conv_w, conv_b, pos_embed, patch_size,
                      token_tile=512, out_dtype=jnp.bfloat16):
    """x_nchw: (N, 3, H, W); conv_w: (hidden, 3, P, P); conv_b: (hidden,);
    pos_embed: (1, Hp, Wp, hidden).  Returns (tokens, idx_kept_tokens=None)."""
    N, Cin, H, W = x_nchw.shape
    P = patch_size
    hidden = conv_w.shape[0]
    Hp, Wp = H // P, W // P
    T = Hp * Wp
    K = Cin * P * P

    # Lane/contraction alignment: pad K and hidden to multiples of 128.
    Kp = _round_up(K, 128)
    Cp = _round_up(hidden, 128)

    # Token tiling: multiples of 16 (bf16 sublane packing), tail tile kept
    # dense by dividing T as evenly as possible across num_t tiles.
    T16 = _round_up(T, 16)
    num_t = max(1, _cdiv(T16, token_tile))
    tT = _round_up(_cdiv(T16, num_t), 16)
    # v7x has 2 TensorCores: make sure there are at least 2 grid steps.
    if N * num_t < 2 and T16 >= 32:
        num_t = 2
        tT = _round_up(_cdiv(T16, num_t), 16)
    Tp = num_t * tT

    # --- glue: im2col in bf16 in (c, kh, kw) order to match PyTorch Conv2d
    # weight layout (out, in, kh, kw).  Marked fusible into the operand DMA. ---
    # TODO(synk): verify in HLO/xprof that allow_input_fusion actually fuses
    # this reshape/transpose/pad/cast into the patch-operand DMA; if a
    # materialized (N,Tp,Kp) bf16 intermediate shows up in HBM, move patch
    # extraction in-kernel (pre-permute to NHWC + pl.ANY + make_async_copy).
    xb = x_nchw.astype(jnp.bfloat16)
    patches = xb.reshape(N, Cin, Hp, P, Wp, P)
    patches = patches.transpose(0, 2, 4, 1, 3, 5)          # (N, Hp, Wp, C, P, P)
    patches = patches.reshape(N, T, K)
    patches = jnp.pad(patches, ((0, 0), (0, Tp - T), (0, Kp - K)))   # (N, Tp, Kp)

    w_mat = conv_w.reshape(hidden, K).T.astype(jnp.bfloat16)         # (K, hidden)
    w_mat = jnp.pad(w_mat, ((0, Kp - K), (0, Cp - hidden)))          # (Kp, Cp)

    # Fold the conv bias into the positional embedding (kept in f32 so the
    # add happens at accumulator precision).
    pos_mat = (pos_embed.reshape(T, hidden).astype(jnp.float32)
               + conv_b.reshape(1, hidden).astype(jnp.float32))      # (T, hidden)
    pos_mat = jnp.pad(pos_mat, ((0, Tp - T), (0, Cp - hidden)))      # (Tp, Cp)

    out_itemsize = jnp.dtype(out_dtype).itemsize
    cost = pl.CostEstimate(
        flops=2 * N * Tp * Kp * Cp,
        bytes_accessed=(N * Tp * Kp * 2          # bf16 patches
                        + Kp * Cp * 2            # bf16 weights (fetched once)
                        + Tp * Cp * 4            # f32 pos(+bias) (fetched once)
                        + N * T * Cp * out_itemsize),
        transcendentals=0,
    )

    tokens = pl.pallas_call(
        _token_kernel,
        # Output token dim is the true T: Pallas masks the boundary tile, so
        # no host-side token slice (a full extra read+write) is needed.
        out_shape=jax.ShapeDtypeStruct((N, T, Cp), out_dtype),
        grid_spec=pltpu.PrefetchScalarGridSpec(
            num_scalar_prefetch=0,
            # Grid is (token tiles, batch): pos block index only depends on the
            # OUTER axis, so it is DMA'd once per tile instead of once per
            # (n, t); weights are fully grid-invariant.
            grid=(num_t, N),
            in_specs=[
                pl.BlockSpec((1, tT, Kp), lambda t, n: (n, t, 0)),   # patches
                pl.BlockSpec((Kp, Cp), lambda t, n: (0, 0)),         # weights (grid-invariant)
                pl.BlockSpec((tT, Cp), lambda t, n: (t, 0)),         # pos(+bias), reused over n
            ],
            out_specs=pl.BlockSpec((1, tT, Cp), lambda t, n: (n, t, 0)),
        ),
        compiler_params=pltpu.CompilerParams(
            dimension_semantics=("parallel", "parallel"),
            vmem_limit_bytes=32 * 1024 * 1024,
            # Let XLA fuse the bf16 im2col (reshape/transpose/pad) into the
            # patch-operand DMA instead of materializing a separate HBM pass.
            allow_input_fusion=[True, False, False],
        ),
        cost_estimate=cost,
    )(patches, w_mat, pos_mat)

    # Lane padding only needs slicing when hidden is not 128-aligned
    # (never for standard ViT widths 768/1024/1280...).
    if Cp != hidden:
        tokens = tokens[:, :, :hidden]

    # seqlen defaults to -1 -> no token dropping; idx_kept_tokens is None.
    # TODO(synk): 'unstructured' random token dropping (torch.randperm gather)
    # and pos-embed bilinear resize for mismatched grids stay host-side.
    return tokens, None


def _reference(x_nchw, conv_w, conv_b, pos_embed, P):
    """Pure-JAX f32 reference mirroring the PyTorch forward (for validation)."""
    y = jax.lax.conv_general_dilated(
        x_nchw, conv_w, window_strides=(P, P), padding="VALID",
        dimension_numbers=("NCHW", "OIHW", "NCHW"))
    y = y + conv_b.reshape(1, -1, 1, 1)
    y = jnp.transpose(y, (0, 2, 3, 1))                   # NHWC
    y = y + pos_embed
    N, Hp, Wp, C = y.shape
    return y.reshape(N, Hp * Wp, C)


if __name__ == "__main__":
    # Small shapes consistent with the module: batch=2, 3-channel 16x16 images,
    # patch_size=4 -> 4x4 = 16 tokens, hidden=32, posembs=(4, 4).
    N, Cin, H, W = 2, 3, 16, 16
    P = 4
    hidden = 32
    Hp, Wp = H // P, W // P

    key = jax.random.PRNGKey(0)
    k_x, k_w, k_b, k_pe = jax.random.split(key, 4)
    x = jax.random.normal(k_x, (N, Cin, H, W), dtype=jnp.float32)
    conv_w = jax.random.normal(k_w, (hidden, Cin, P, P), dtype=jnp.float32) * 0.02
    conv_b = jax.random.normal(k_b, (hidden,), dtype=jnp.float32) * 0.02
    pos_embed = (jax.random.normal(k_pe, (1, Hp, Wp, hidden), dtype=jnp.float32)
                 * (1.0 / math.sqrt(hidden)))

    tokens, idx = to_token_sequence(x, conv_w, conv_b, pos_embed, P)
    tokens = jax.block_until_ready(tokens)

    ref = _reference(x, conv_w, conv_b, pos_embed, P)
    assert tokens.shape == (N, Hp * Wp, hidden), tokens.shape
    assert tokens.dtype == jnp.bfloat16, tokens.dtype
    assert idx is None
    max_err = float(jnp.max(jnp.abs(tokens.astype(jnp.float32) - ref)))
    # bf16 operands + bf16 output with f32 accumulation: loosened tolerance
    # vs the f32 reference.
    assert max_err < 2e-2, f"mismatch vs reference: max abs err {max_err}"

    print("KERNEL_OK")
</pallas_src>

<mosaic_0001>
module attributes {stable_mosaic.version = 11 : i64} {
  func.func @_token_kernel(%arg0: i32, %arg1: i32, %arg2: memref<1x16x128xbf16, #tpu.memory_space<vmem>>, %arg3: memref<128x128xbf16, #tpu.memory_space<vmem>>, %arg4: memref<16x128xf32, #tpu.memory_space<vmem>>, %arg5: memref<1x16x128xbf16, #tpu.memory_space<vmem>>) attributes {dimension_semantics = [#tpu.dimension_semantics<parallel>, #tpu.dimension_semantics<parallel>], iteration_bounds = array<i64: 1, 2>, scalar_prefetch = 0 : i64, scratch_operands = 0 : i64, tpu.core_type = #tpu.core_type<tc>, window_params = [{transform_indices = @transform_0, window_bounds = array<i64: 1, 16, 128>}, {pipeline_mode = #tpu.pipeline_mode<synchronous>, transform_indices = @transform_1, window_bounds = array<i64: 128, 128>}, {transform_indices = @transform_2, window_bounds = array<i64: 16, 128>}, {transform_indices = @transform_3, window_bounds = array<i64: 1, 16, 128>}]} {
    %c0 = arith.constant 0 : index
    %c0_0 = arith.constant 0 : index
    %c0_1 = arith.constant 0 : index
    %0 = vector.load %arg2[%c0, %c0_0, %c0_1] : memref<1x16x128xbf16, #tpu.memory_space<vmem>>, vector<1x16x128xbf16>
    %1 = vector.shape_cast %0 : vector<1x16x128xbf16> to vector<16x128xbf16>
    %c0_2 = arith.constant 0 : index
    %c0_3 = arith.constant 0 : index
    %2 = vector.load %arg3[%c0_2, %c0_3] : memref<128x128xbf16, #tpu.memory_space<vmem>>, vector<128x128xbf16>
    %cst = arith.constant dense<0.000000e+00> : vector<16x128xf32>
    %3 = tpu.matmul %1, %2, %cst {dimension_numbers = #tpu.dot_dimension_numbers<[1], [0], [0], [1], [0, 0, 1, 1], [], []>} : vector<16x128xbf16>, vector<128x128xbf16>, vector<16x128xf32> -> vector<16x128xf32>
    %c0_4 = arith.constant 0 : index
    %c0_5 = arith.constant 0 : index
    %4 = vector.load %arg4[%c0_4, %c0_5] : memref<16x128xf32, #tpu.memory_space<vmem>>, vector<16x128xf32>
    %5 = arith.addf %3, %4 : vector<16x128xf32>
    %6 = arith.truncf %5 : vector<16x128xf32> to vector<16x128xbf16>
    %c0_6 = arith.constant 0 : index
    %c0_7 = arith.constant 0 : index
    %c0_8 = arith.constant 0 : index
    %7 = vector.load %arg5[%c0_6, %c0_7, %c0_8] : memref<1x16x128xbf16, #tpu.memory_space<vmem>>, vector<1x16x128xbf16>
    %8 = vector.shape_cast %7 : vector<1x16x128xbf16> to vector<16x128xbf16>
    %9 = vector.shape_cast %6 : vector<16x128xbf16> to vector<1x16x128xbf16>
    tpu.vector_store %arg5[%c0_6, %c0_7, %c0_8], %9 {strides = array<i32>} : memref<1x16x128xbf16, #tpu.memory_space<vmem>>, vector<1x16x128xbf16>,
    return
  }
  func.func @transform_0(%arg0: i32, %arg1: i32) -> (i32, i32, i32) {
    %c0_i32 = arith.constant 0 : i32
    %c0_i32_0 = arith.constant 0 : i32
    return %arg1, %arg0, %c0_i32 : i32, i32, i32
  }
  func.func @transform_1(%arg0: i32, %arg1: i32) -> (i32, i32) {
    %c0_i32 = arith.constant 0 : i32
    %c0_i32_0 = arith.constant 0 : i32
    %c0_i32_1 = arith.constant 0 : i32
    return %c0_i32, %c0_i32_0 : i32, i32
  }
  func.func @transform_2(%arg0: i32, %arg1: i32) -> (i32, i32) {
    %c0_i32 = arith.constant 0 : i32
    %c0_i32_0 = arith.constant 0 : i32
    return %arg0, %c0_i32 : i32, i32
  }
  func.func @transform_3(%arg0: i32, %arg1: i32) -> (i32, i32, i32) {
    %c0_i32 = arith.constant 0 : i32
    %c0_i32_0 = arith.constant 0 : i32
    return %arg1, %arg0, %c0_i32 : i32, i32, i32
  }
}

</mosaic_0001>

<bundles_post_ra>
// kernel: to_token_sequence.2
= control target key start
LH: loop header
LB: loop body
LE: loop exit
PB: predicated region body
PF: predicated region fallthrough
CT: control target
= control target key end

     0   :  { %s900_s0 = inlined_call_operand.vmem [shape: bf16[128,128], index: 0, kind: input, shape index: {}]   ;;  %s901_s1 = inlined_call_operand.vmem [shape: f32[16,128], index: 1, kind: input, shape index: {}]   ;;  %s902_s2 = inlined_call_operand.vmem [shape: bf16[2,16,48], index: 2, kind: input, shape index: {}]   ;;  %s903_s3 = inlined_call_operand.<no memory space> [shape: bf16[], index: 3, kind: input, shape index: {}]   ;;  %s904_s4 = inlined_call_operand.hbm [shape: bf16[2,16,128], index: 4, kind: output, shape index: {}]  }
   0x1   :  { %v9_v0 = vstv %s903_s3 }
   0x2   :  { %v751_v1 = vunpack.i.l.bf16 %v9_v0 }
   0x3   :  { %14 = vsyncpa [#allocation8], 0 }
   0x4   :  { %16 = vsyncpa [#allocation8 + $0x1], 0  ;;  %s753_s17 = smov 0   ;;  %s755_s18 = smov 0  }
   0x5   :  { %s757_s19 = smov 0   ;;  %s759_s20 = smov 0  }
   0x6   :  { %s761_s21 = smov 0   ;;  %s763_s22 = smov 0  }
   0x7 LB: > { %s506_s3 = sadd.s32 4294967295, %s716_s22   ;;  %s507_s23 = sadd.s32 4294967294, %s716_s22   ;;  %s716_s22 = sphi %s763_s22, %s22_s22   ;;  %s712_s21 = sphi %s761_s21, %s911_s21   ;;  %s708_s20 = sphi %s759_s20, %s910_s20   ;;  %s704_s19 = sphi %s757_s19, %s909_s19   ;;  %s700_s18 = sphi %s755_s18, %s908_s18   ;;  %s696_s17 = sphi %s753_s17, %s907_s17  }
   0x8   : > { %s31_s24 = sadd.s32 1, %s712_s21  ;;  %s118_s25 = sadd.s32 1, %s704_s19 }
   0x9   : > { %p32_p0 = scmp.ge.s32.totalorder %s31_s24, 2  ;;  %p128_p1 = scmp.ne.s32.totalorder %s704_s19, %s700_s18 }
   0xa   : > { %p129_p2 = scmp.eq.s32.totalorder %s506_s3, 1  ;;  %p134_p3 = scmp.ne.s32.totalorder %s700_s18, %s696_s17 }
   0xb   : > { %s913_s24 = smov (%p32_p0, %s31_s24), 0  ;;  %p135_p5 = scmp.eq.s32.totalorder %s507_s23, 1 }
   0xc   : > { %p793_p4 = por %p129_p2, %p128_p1  ;;  %s113_s27 = ssub.s32 %s712_s21, %s913_s24 }
   0xd   : > { %p511_p6 = scmp.ge.s32.totalorder %s716_s22, 1  ;;  %p116_p7 = scmp.eq.s32.totalorder %s113_s27, 0 }
   0xe   : > { %p800_p8 = por %p135_p5, %p134_p3  ;;  %p178_p9 = scmp.lt.s32.totalorder %s716_s22, 3 }
   0xf   : > { %s806_s29 = scalar_select %p116_p7, %s704_s19, %s118_s25  }
  0x10   : > { %p179_p10 = pnand %p511_p6, %p178_p9 }
  0x12   : > { %182 = sbr.rel (%p179_p10) target bundleno = 291 (0x123), region = 32 }
  0x19   : > { %v629_v2 = vld [vmem:[%s900_s0] sm:$0xff]   ;;  %v240_v3 = vlaneseq  ;;  %v718_v4 = vmov 0.0   ;;  %v630_v5 = vld [vmem:[%s900_s0 + $0x8] sm:$0xff]   ;;  %vm719_vm0 = vmmov 0   ;;  %p212_p11 = scmp.lt.s32.totalorder %s708_s20, 1  ;;  %v631_v7 = vld [vmem:[%s900_s0 + $0x10] sm:$0xff]  }
  0x1a   : > { %550 = vmatprep.subr.bf16.mxu0 %v718_v4  ;;  %566 = vmatprep.mubr.msk.bf16.mxu0 %vm719_vm0, %v718_v4  ;;  %v632_v11 = vld [vmem:[%s900_s0 + $0x18] sm:$0xff]   ;;  %v633_v16 = vld [vmem:[%s900_s0 + $0x20] sm:$0xff]   ;;  %v634_v17 = vld [vmem:[%s900_s0 + $0x28] sm:$0xff]   ;;  %s535_s16 = sshll.u32 %s708_s20, 7 }
  0x1b   : > { %551 = vmatpush3.bf16.msra.mxu0 %v629_v2  ;;  %s213_s8 = scalar_select %p212_p11, %s708_s20, 1  ;;  %v241_v6 = vand.u32 127, %v240_v3  ;;  %v635_v18 = vld [vmem:[%s900_s0 + $0x30] sm:$0xff]   ;;  %v636_v19 = vld [vmem:[%s900_s0 + $0x38] sm:$0xff]   ;;  %v289_v21 = vld [vmem:[%s901_s1] sm:$0xff] }
  0x1c   : > { %552 = vmatprep.subr.bf16.mxu0 %v718_v4  ;;  %v290_v23 = vld [vmem:[%s901_s1 + $0x8] sm:$0xff]  ;;  %s852_s25 = scalar_lea.hbm %s904_s4, %s535_s16  ;;  %s720_s20 = smov [#allocation7]  }
  0x1d   : > { %s532_s11 = sshll.u32 %s213_s8, 3  ;;  %vm243_vm1 = vcmp.lt.s32.totalorder %v241_v6, 48  ;;  %s208_s8 = sand.u32 1, %s700_s18  }
  0x1e   : > { %s219_s14 = scalar_lea.vmem %s902_s2, %s532_s11  ;;  %s512_s9 = sshll.u32 %s208_s8, 3 }
  0x1f   : > { %553 = vmatpush3.bf16.msra.mxu0 %v630_v5  ;;  %v237_v8 = vld [vmem:[%s219_s14] sm:$0xff]   ;;  %s210_s14 = scalar_lea.vmem [#allocation7], %s512_s9  ;;  %s854_s27 = scalar_lea.sflag [#allocation8], %s208_s8 }
  0x20   : > { %554 = vmatprep.subr.bf16.mxu0 %v718_v4  ;;  %v238_v9 = vunpack.c.l.bf16 %v237_v8  ;;  %v259_v10 = vunpack.c.h.bf16 %v237_v8  ;;  %s412_s15 = sshll.u32 %s210_s14, 4  ;;  %s642_s5 = sshll.u32 %s720_s20, 4  ;;  %s847_s15 = int_to_ptr.vmem [resolvable:$true] %s412_s15  ;;  %s643_s5 = int_to_ptr.vmem [resolvable:$false] %s642_s5 }
  0x21   : > { %s638_s30 = scalar_lea.vmem %s847_s15, 128  ;;  %s644_s6 = scalar_lea.vmem %s643_s5, 256 }
  0x22   : > { %v244_v12 = vsel %vm243_vm1, %v238_v9, %v751_v1  ;;  %v265_v13 = vsel %vm243_vm1, %v259_v10, %v751_v1  ;;  %p639_p12 = scmp.ne.s32.totalorder %s847_s15, %s638_s30  ;;  %p645_p1 = scmp.lt.s32.totalorder %s847_s15, %s643_s5 }
  0x23   : > { %555 = vmatpush3.bf16.msra.mxu0 %v631_v7  ;;  %v245_v14 = vpack.c.bf16 %v718_v4, %v244_v12  ;;  %v267_v15 = vpack.c.bf16 %v718_v4, %v265_v13  ;;  %p646_p2 = scmp.lt.s32.totalorder %s644_s6, %s638_s30 }
  0x24   : > { %556 = vmatprep.subr.bf16.mxu0 %v718_v4  ;;  %p640_p13 = pnand %p639_p12, %p793_p4 }
  0x25   : > { %247 = vst [vmem:[#allocation9] sm:$0xf] %v245_v14  ;;  %269 = vst [vmem:[#allocation9 + $0x4] sm:$0xf] %v267_v15  ;;  %p647_p3 = por %p646_p2, %p645_p1 }
  0x26   : > { %p641_p0 = pneg %p640_p13 }
  0x27   : > { %557 = vmatpush3.bf16.msra.mxu0 %v632_v11 }
  0x28   : > { %558 = vmatprep.subr.bf16.mxu0 %v718_v4  ;;  %p648_p5 = pnand %p647_p3, %p641_p0 }
  0x2b   : > { %559 = vmatpush3.bf16.msra.mxu0 %v633_v16 }
  0x2c   : > { %560 = vmatprep.subr.bf16.mxu0 %v718_v4  ;;  %v637_v20 = vld [vmem:[#allocation9] sm:$0xff]  }
  0x2f   : > { %561 = vmatpush3.bf16.msra.mxu0 %v634_v17 }
  0x30   : > { %562 = vmatprep.subr.bf16.mxu0 %v718_v4 }
  0x33   : > { %563 = vmatpush3.bf16.msra.mxu0 %v635_v18 }
  0x34   : > { %564 = vmatprep.subr.bf16.mxu0 %v718_v4 }
  0x37   : > { %565 = vmatpush3.bf16.msra.mxu0 %v636_v19 }
  0x3a   : > { %567 = vmatmul.mubr.bf16.vlgmr.msra.gmra.mrb[0].mxu0 %v637_v20 }
 0x10d   : > { %v379_v22 = vpop.f32.mrb[0].mxu0 }
 0x10e   : > { %v568_v24 = vpop.f32.mrb[1].mxu0  ;;  %v380_v26 = vadd.f32 %v379_v22, %v289_v21 }
 0x10f   : > { %v382_v25 = vpop.f32.mrb[2].mxu0 }
 0x110   : > { %v383_v27 = vadd.f32 %v382_v25, %v290_v23  ;;  %v569_v28 = vpop.f32.mrb[3].mxu0 }
 0x112   : > { %v539_v29 = vpack.c.bf16 %v383_v27, %v380_v26 }
 0x114   : > { %540 = vst [vmem:[%s210_s14] sm:$0xff] %v539_v29  }
 0x115   : > { %651 = shalt.err (!%p648_p5)
}
 0x116   : > { %s652_s7 = scalar_lea.hbm %s852_s25, 128  ;;  %s656_s10 = scalar_lea.hbm %s904_s4, 256 }
 0x117   : > { %p653_p6 = scmp.ne.s32.totalorder %s852_s25, %s652_s7  ;;  %p657_p10 = scmp.lt.u32.totalorder %s852_s25, %s904_s4 }
 0x118   : > { %p658_p11 = scmp.lt.u32.totalorder %s656_s10, %s652_s7  ;;  %p660_p13 = scmp.lt.u32.totalorder %s652_s7, %s852_s25 }
 0x119   : > { %p654_p7 = pnand %p653_p6, %p793_p4 }
 0x11a   : > { %p659_p12 = por %p658_p11, %p657_p10 }
 0x11b   : > { %p655_p9 = pneg %p654_p7 }
 0x11c   : > { %p661_p0 = por %p660_p13, %p659_p12 }
 0x11e   : > { %p662_p1 = pnand %p661_p0, %p655_p9 }
 0x120   : > { %665 = shalt.err (!%p662_p1)
}
 0x121   : > { %s721_s13 = smov 64   ;;  %s722_s14 = smov 4  }
 0x122   : > { %570 = dma.vmem_to_hbm [thread:$0]  (%p793_p4), %s847_s15, 128, %s852_s25, %s854_s27, %s721_s13, %s721_s13, %s722_s14  }
 0x123 PF: > { %p576_p2 = scmp.ge.s32.totalorder %s716_s22, 2  ;;  %s427_s16 = sand.u32 1, %s696_s17  }
 0x124   : > { %s428_s3 = scalar_lea.sflag [#allocation8], %s427_s16 }
 0x125   : > { %p573_p3 = pnand %p576_p2, %p800_p8 }
 0x127   : > { %691 = dma.done.wait (!%p573_p3), %s428_s3, 128  }
 0x128   : > { %693 = vsyncadd (!%p573_p3), %s428_s3, 4294967168  ;;  %s22_s22 = sadd.s32 1, %s716_s22   ;;  %s907_s17 = smov %s700_s18 }
 0x129   : > { %p19_p5 = scmp.ge.s32.totalorder %s22_s22, 4   ;;  %s908_s18 = smov %s704_s19 }
 0x12a   : > { %s909_s19 = smov %s806_s29  ;;  %s910_s20 = smov %s712_s21 }
 0x12b   : > { %s911_s21 = smov %s913_s24  ;;  %21 = sbr.rel (!%p19_p5) target bundleno = 7 (0x7), region = 72 }
 0x132   :  { %433 = vsyncpa [#allocation8], 1 }
 0x133   :  { %435 = vsyncpa [#allocation8 + $0x1], 1 }

</bundles_post_ra>
